<compile_context>
chip_gen: v7x
topology: tpu7x:2x2x1
jax: 0.10.0
libtpu: 0.0.40
codegen_flags: <defaults>
</compile_context>

<pallas_src>
import functools
import math

import jax
import jax.numpy as jnp
from jax.experimental import pallas as pl
from jax.experimental.pallas import tpu as pltpu

# ---- small config mirroring Qwen2VLAttention (scaled down) ----------------
HIDDEN = 32
NUM_HEADS = 4
HEAD_DIM = HIDDEN // NUM_HEADS          # 8
NUM_KV_HEADS = 2
NUM_KV_GROUPS = NUM_HEADS // NUM_KV_HEADS
ROPE_THETA = 10000.0
MROPE_SECTION = (2, 1, 1)               # sums to HEAD_DIM // 2


# ---------------------------------------------------------------------------
# Pallas kernels
# ---------------------------------------------------------------------------
def _linear_bias_kernel(x_ref, w_ref, b_ref, o_ref):
    # x: (tm, K), w: (K, N) (already transposed in the wrapper), b: (1, N).
    # Operands are fed in their native dtype; the MXU accumulates in f32.
    acc = jnp.dot(x_ref[...], w_ref[...], preferred_element_type=jnp.float32)
    o_ref[...] = (acc + b_ref[...].astype(jnp.float32)).astype(o_ref.dtype)


def _linear_kernel(x_ref, w_ref, o_ref):
    acc = jnp.dot(x_ref[...], w_ref[...], preferred_element_type=jnp.float32)
    o_ref[...] = acc.astype(o_ref.dtype)


def linear(x2d, w_kn, bias=None, *, tm=256):
    """y = x2d @ w_kn (+ bias).  w_kn is (K, N) — i.e. torch weight.T."""
    M, K = x2d.shape
    K2, N = w_kn.shape
    assert K == K2
    tm = M if M <= tm else tm
    assert M % tm == 0, "demo linear expects tm | M"
    cost = pl.CostEstimate(
        flops=2 * M * K * N,
        transcendentals=0,
        bytes_accessed=(M * K + K * N + M * N) * x2d.dtype.itemsize,
    )
    params = pltpu.CompilerParams(dimension_semantics=("parallel",))
    if bias is not None:
        bias2d = bias.reshape(1, N)
        return pl.pallas_call(
            _linear_bias_kernel,
            out_shape=jax.ShapeDtypeStruct((M, N), x2d.dtype),
            grid=(M // tm,),
            in_specs=[
                pl.BlockSpec((tm, K), lambda i: (i, 0)),
                pl.BlockSpec((K, N), lambda i: (0, 0)),
                pl.BlockSpec((1, N), lambda i: (0, 0)),
            ],
            out_specs=pl.BlockSpec((tm, N), lambda i: (i, 0)),
            compiler_params=params,
            cost_estimate=cost,
        )(x2d, w_kn, bias2d)
    return pl.pallas_call(
        _linear_kernel,
        out_shape=jax.ShapeDtypeStruct((M, N), x2d.dtype),
        grid=(M // tm,),
        in_specs=[
            pl.BlockSpec((tm, K), lambda i: (i, 0)),
            pl.BlockSpec((K, N), lambda i: (0, 0)),
        ],
        out_specs=pl.BlockSpec((tm, N), lambda i: (i, 0)),
        compiler_params=params,
        cost_estimate=cost,
    )(x2d, w_kn)


def _attn_kernel(q_ref, k_ref, v_ref, cos_ref, sin_ref, o_ref, *,
                 scale, n_kv_heads, n_groups, head_dim):
    """Causal GQA attention for one batch element, RoPE fused in.

    q_ref:  (1, S, Hq*D)   lane-dense, head-major columns
    k_ref:  (1, S, Hkv*D)
    v_ref:  (1, S, Hkv*D)
    cos/sin:(1, S, D)      multimodal rotary tables (shared across heads)
    o_ref:  (1, S, Hq*D)   lane-dense output (feeds o_proj directly)
    """
    D = head_dim
    S = q_ref.shape[1]

    q = q_ref[0]
    k = k_ref[0]
    v = v_ref[0]
    cos = cos_ref[0]
    sin = sin_ref[0]

    half = D // 2

    def rope(x):  # x: (S, D)
        x_rot = jnp.concatenate([-x[:, half:], x[:, :half]], axis=-1)
        return x * cos + x_rot * sin

    # Causal mask for the group-stacked (G*S, S) score matrix: row r of the
    # stack corresponds to query position r % S.
    row = jax.lax.broadcasted_iota(jnp.int32, (n_groups * S, S), 0)
    col = jax.lax.broadcasted_iota(jnp.int32, (n_groups * S, S), 1)
    causal = col <= (row % S)

    out_heads = [None] * (n_kv_heads * n_groups)
    for kv in range(n_kv_heads):
        # repeat_kv handled implicitly: one KV head serves its whole group.
        k_h = rope(k[:, kv * D:(kv + 1) * D])          # (S, D)
        v_h = v[:, kv * D:(kv + 1) * D]                # (S, D)

        # Stack the group's query heads along the sublane axis -> one matmul.
        q_grp = jnp.concatenate(
            [rope(q[:, (kv * n_groups + g) * D:(kv * n_groups + g + 1) * D])
             for g in range(n_groups)], axis=0)        # (G*S, D)

        s = jax.lax.dot_general(
            q_grp, k_h, dimension_numbers=(((1,), (1,)), ((), ())),
            preferred_element_type=jnp.float32) * scale        # (G*S, S)
        s = jnp.where(causal, s, -1e30)

        m = jnp.max(s, axis=-1, keepdims=True)
        p = jnp.exp(s - m)
        denom = jnp.sum(p, axis=-1, keepdims=True)
        o = jnp.dot(p.astype(v_h.dtype), v_h,
                    preferred_element_type=jnp.float32)        # (G*S, D)
        o = o * pl.reciprocal(denom, approx=True)

        for g in range(n_groups):
            out_heads[kv * n_groups + g] = o[g * S:(g + 1) * S, :]

    # Single lane-dense store of all heads.
    o_ref[0] = jnp.concatenate(out_heads, axis=-1).astype(o_ref.dtype)


def attention(q, k, v, cos, sin):
    """q: (B, S, Hq*D); k, v: (B, S, Hkv*D); cos/sin: (B, S, D)."""
    B, S, NQ = q.shape
    D = HEAD_DIM
    n_kv = k.shape[-1] // D
    n_q = NQ // D
    groups = n_q // n_kv
    scale = 1.0 / math.sqrt(D)

    kernel = functools.partial(_attn_kernel, scale=scale, n_kv_heads=n_kv,
                               n_groups=groups, head_dim=D)
    cost = pl.CostEstimate(
        flops=4 * B * n_q * S * S * D,
        transcendentals=B * n_q * S * S,
        bytes_accessed=(2 * q.size + k.size + v.size + cos.size + sin.size) * 4,
    )
    return pl.pallas_call(
        kernel,
        out_shape=jax.ShapeDtypeStruct((B, S, NQ), q.dtype),
        grid=(B,),
        in_specs=[
            pl.BlockSpec((1, S, NQ), lambda b: (b, 0, 0)),
            pl.BlockSpec((1, S, n_kv * D), lambda b: (b, 0, 0)),
            pl.BlockSpec((1, S, n_kv * D), lambda b: (b, 0, 0)),
            pl.BlockSpec((1, S, D), lambda b: (b, 0, 0)),
            pl.BlockSpec((1, S, D), lambda b: (b, 0, 0)),
        ],
        out_specs=pl.BlockSpec((1, S, NQ), lambda b: (b, 0, 0)),
        compiler_params=pltpu.CompilerParams(
            dimension_semantics=("parallel",)),
        cost_estimate=cost,
    )(q, k, v, cos, sin)


# ---------------------------------------------------------------------------
# Plain-JAX glue: multimodal rotary embedding tables (Qwen2VL mrope)
# ---------------------------------------------------------------------------
def mrope_cos_sin(position_ids, head_dim, theta, mrope_section, dtype):
    # position_ids: (3, B, S)
    inv_freq = 1.0 / (theta ** (jnp.arange(0, head_dim, 2, dtype=jnp.float32)
                                / head_dim))                        # (D/2,)
    freqs = position_ids.astype(jnp.float32)[..., None] * inv_freq  # (3,B,S,D/2)
    emb = jnp.concatenate([freqs, freqs], axis=-1)                  # (3,B,S,D)
    cos = jnp.cos(emb)
    sin = jnp.sin(emb)

    sections = list(mrope_section) * 2

    def combine(t):
        pieces, start = [], 0
        for i, sec in enumerate(sections):
            pieces.append(t[i % 3, ..., start:start + sec])
            start += sec
        return jnp.concatenate(pieces, axis=-1)                     # (B,S,D)

    return combine(cos).astype(dtype), combine(sin).astype(dtype)


def rotate_half(x):
    d = x.shape[-1]
    return jnp.concatenate([-x[..., d // 2:], x[..., :d // 2]], axis=-1)


def apply_mrope(q, k, cos, sin):
    # (reference helper) q, k: (B, H, S, D); cos/sin: (B, S, D)
    cos = cos[:, None, :, :]
    sin = sin[:, None, :, :]
    q_emb = q * cos + rotate_half(q) * sin
    k_emb = k * cos + rotate_half(k) * sin
    return q_emb, k_emb


# ---------------------------------------------------------------------------
# Full forward
# ---------------------------------------------------------------------------
def qwen2vl_attention_forward(hidden_states, position_ids, params):
    B, S, H = hidden_states.shape
    x2d = hidden_states.reshape(B * S, H)

    nq = NUM_HEADS * HEAD_DIM
    nkv = NUM_KV_HEADS * HEAD_DIM

    # Fused QKV projection: one lane-dense matmul with pre-transposed weights.
    # (In a real model w_qkv / b_qkv would be precomputed once at load time.)
    w_qkv = jnp.concatenate(
        [params["q_w"], params["k_w"], params["v_w"]], axis=0).T    # (K, Ntot)
    b_qkv = jnp.concatenate([params["q_b"], params["k_b"], params["v_b"]])
    qkv = linear(x2d, w_qkv, b_qkv)                                 # (B*S, Ntot)

    q = qkv[:, :nq].reshape(B, S, nq)                               # (B,S,Hq*D)
    k = qkv[:, nq:nq + nkv].reshape(B, S, nkv)                      # (B,S,Hkv*D)
    v = qkv[:, nq + nkv:].reshape(B, S, nkv)

    cos, sin = mrope_cos_sin(position_ids, HEAD_DIM, ROPE_THETA,
                             MROPE_SECTION, jnp.float32)

    # Causal GQA attention with RoPE fused into the kernel; lane-dense output.
    attn = attention(q, k, v, cos, sin)                             # (B,S,Hq*D)

    out = linear(attn.reshape(B * S, nq), params["o_w"].T, None)
    return out.reshape(B, S, H)


# ---------------------------------------------------------------------------
# Pure-JAX reference (same math, no Pallas) for a sanity check
# ---------------------------------------------------------------------------
def reference_forward(hidden_states, position_ids, params):
    B, S, H = hidden_states.shape
    x2d = hidden_states.reshape(B * S, H)
    q = (x2d @ params["q_w"].T + params["q_b"]).reshape(B, S, NUM_HEADS, HEAD_DIM)
    k = (x2d @ params["k_w"].T + params["k_b"]).reshape(B, S, NUM_KV_HEADS, HEAD_DIM)
    v = (x2d @ params["v_w"].T + params["v_b"]).reshape(B, S, NUM_KV_HEADS, HEAD_DIM)
    q, k, v = (t.transpose(0, 2, 1, 3) for t in (q, k, v))
    cos, sin = mrope_cos_sin(position_ids, HEAD_DIM, ROPE_THETA,
                             MROPE_SECTION, hidden_states.dtype)
    q, k = apply_mrope(q, k, cos, sin)
    k = jnp.repeat(k, NUM_KV_GROUPS, axis=1)
    v = jnp.repeat(v, NUM_KV_GROUPS, axis=1)
    s = jnp.einsum("bhqd,bhkd->bhqk", q, k) / math.sqrt(HEAD_DIM)
    mask = jnp.tril(jnp.ones((S, S), bool))
    s = jnp.where(mask[None, None], s, -jnp.inf)
    p = jax.nn.softmax(s, axis=-1)
    o = jnp.einsum("bhqk,bhkd->bhqd", p, v)
    o = o.transpose(0, 2, 1, 3).reshape(B * S, HIDDEN)
    return (o @ params["o_w"].T).reshape(B, S, H)


# ---------------------------------------------------------------------------
if __name__ == "__main__":
    key = jax.random.PRNGKey(0)
    ks = jax.random.split(key, 8)

    B, S = 2, 8
    hidden_states = jax.random.normal(ks[0], (B, S, HIDDEN), jnp.float32)
    # position_ids: (3, B, S) — temporal / height / width all arange for text
    pos = jnp.arange(S, dtype=jnp.int32)
    position_ids = jnp.broadcast_to(pos[None, None, :], (3, B, S))

    init = lambda k_, shape: 0.02 * jax.random.normal(k_, shape, jnp.float32)
    params = {
        "q_w": init(ks[1], (NUM_HEADS * HEAD_DIM, HIDDEN)),
        "q_b": init(ks[2], (NUM_HEADS * HEAD_DIM,)),
        "k_w": init(ks[3], (NUM_KV_HEADS * HEAD_DIM, HIDDEN)),
        "k_b": init(ks[4], (NUM_KV_HEADS * HEAD_DIM,)),
        "v_w": init(ks[5], (NUM_KV_HEADS * HEAD_DIM, HIDDEN)),
        "v_b": init(ks[6], (NUM_KV_HEADS * HEAD_DIM,)),
        "o_w": init(ks[7], (HIDDEN, NUM_HEADS * HEAD_DIM)),
    }

    out = qwen2vl_attention_forward(hidden_states, position_ids, params)
    out = jax.block_until_ready(out)

    ref = reference_forward(hidden_states, position_ids, params)
    assert out.shape == (B, S, HIDDEN)
    assert jnp.allclose(out, ref, atol=2e-3, rtol=2e-2), "mismatch vs reference"

    print("KERNEL_OK")
</pallas_src>

<mosaic_0001>
module attributes {stable_mosaic.version = 11 : i64} {
  func.func @_linear_bias_kernel(%arg0: i32, %arg1: memref<16x32xf32, #tpu.memory_space<vmem>>, %arg2: memref<32x64xf32, #tpu.memory_space<vmem>>, %arg3: memref<1x64xf32, #tpu.memory_space<vmem>>, %arg4: memref<16x64xf32, #tpu.memory_space<vmem>>) attributes {dimension_semantics = [#tpu.dimension_semantics<parallel>], iteration_bounds = array<i64: 1>, scalar_prefetch = 0 : i64, scratch_operands = 0 : i64, tpu.core_type = #tpu.core_type<tc>, window_params = [{transform_indices = @transform_0, window_bounds = array<i64: 16, 32>}, {pipeline_mode = #tpu.pipeline_mode<synchronous>, transform_indices = @transform_1, window_bounds = array<i64: 32, 64>}, {pipeline_mode = #tpu.pipeline_mode<synchronous>, transform_indices = @transform_2, window_bounds = array<i64: 1, 64>}, {transform_indices = @transform_3, window_bounds = array<i64: 16, 64>}]} {
    %c0 = arith.constant 0 : index
    %c0_0 = arith.constant 0 : index
    %0 = vector.load %arg1[%c0, %c0_0] : memref<16x32xf32, #tpu.memory_space<vmem>>, vector<16x32xf32>
    %c0_1 = arith.constant 0 : index
    %c0_2 = arith.constant 0 : index
    %1 = vector.load %arg2[%c0_1, %c0_2] : memref<32x64xf32, #tpu.memory_space<vmem>>, vector<32x64xf32>
    %cst = arith.constant dense<0.000000e+00> : vector<16x64xf32>
    %2 = tpu.matmul %0, %1, %cst {dimension_numbers = #tpu.dot_dimension_numbers<[1], [0], [0], [1], [0, 0, 1, 1], [], []>} : vector<16x32xf32>, vector<32x64xf32>, vector<16x64xf32> -> vector<16x64xf32>
    %c0_3 = arith.constant 0 : index
    %c0_4 = arith.constant 0 : index
    %3 = vector.load %arg3[%c0_3, %c0_4] : memref<1x64xf32, #tpu.memory_space<vmem>>, vector<1x64xf32>
    %4 = vector.broadcast %3 : vector<1x64xf32> to vector<16x64xf32>
    %5 = arith.addf %2, %4 : vector<16x64xf32>
    %c0_5 = arith.constant 0 : index
    %c0_6 = arith.constant 0 : index
    %6 = vector.load %arg4[%c0_5, %c0_6] : memref<16x64xf32, #tpu.memory_space<vmem>>, vector<16x64xf32>
    tpu.vector_store %arg4[%c0_5, %c0_6], %5 {strides = array<i32>} : memref<16x64xf32, #tpu.memory_space<vmem>>, vector<16x64xf32>,
    return
  }
  func.func @transform_0(%arg0: i32) -> (i32, i32) {
    %c0_i32 = arith.constant 0 : i32
    %c0_i32_0 = arith.constant 0 : i32
    return %arg0, %c0_i32 : i32, i32
  }
  func.func @transform_1(%arg0: i32) -> (i32, i32) {
    %c0_i32 = arith.constant 0 : i32
    %c0_i32_0 = arith.constant 0 : i32
    %c0_i32_1 = arith.constant 0 : i32
    return %c0_i32, %c0_i32_0 : i32, i32
  }
  func.func @transform_2(%arg0: i32) -> (i32, i32) {
    %c0_i32 = arith.constant 0 : i32
    %c0_i32_0 = arith.constant 0 : i32
    %c0_i32_1 = arith.constant 0 : i32
    return %c0_i32, %c0_i32_0 : i32, i32
  }
  func.func @transform_3(%arg0: i32) -> (i32, i32) {
    %c0_i32 = arith.constant 0 : i32
    %c0_i32_0 = arith.constant 0 : i32
    return %arg0, %c0_i32 : i32, i32
  }
}

</mosaic_0001>

<bundles_post_ra>
// kernel: tpu_custom_call.1
= control target key start
LH: loop header
LB: loop body
LE: loop exit
PB: predicated region body
PF: predicated region fallthrough
CT: control target
= control target key end

     0   :  { %8 = vsyncpa [#allocation3], 0  ;;  %s337_s0 = inlined_call_operand.hbm [shape: f32[16,32], index: 0, kind: input, shape index: {}]   ;;  %s338_s1 = inlined_call_operand.hbm [shape: f32[32,64], index: 1, kind: input, shape index: {}]   ;;  %s339_s2 = inlined_call_operand.vmem [shape: f32[1,64], index: 2, kind: input, shape index: {}]   ;;  %s340_s3 = inlined_call_operand.hbm [shape: f32[16,64], index: 3, kind: output, shape index: {}]  }
   0x1   :  { %9 = vsyncpa [#allocation6], 0 }
   0x2   :  { %10 = vsyncpa [#allocation4], 0  ;;  %s264_s12 = smov [#allocation2]   ;;  %s192_s16 = scalar_lea.hbm %s337_s0, 256 }
   0x3   :  { %s16_s13 = sshll.u32 %s264_s12, 4  ;;  %p193_p0 = scmp.ne.s32.totalorder %s337_s0, %s192_s16  ;;  %s17_s13 = int_to_ptr.vmem [resolvable:$true] %s16_s13 }
   0x4   :  { %p196_p1 = scmp.lt.u32.totalorder %s192_s16, %s337_s0 }
   0x6   :  { %p198_p2 = pnand %p196_p1, %p193_p0 }
   0x8   :  { %201 = shalt.err (!%p198_p2)
}
   0x9   :  { %s202_s21 = scalar_lea.vmem %s17_s13, 256  ;;  %p207_p4 = scmp.lt.s32.totalorder %s17_s13, %s17_s13 }
   0xa   :  { %p203_p3 = scmp.ne.s32.totalorder %s17_s13, %s202_s21  ;;  %p208_p5 = scmp.lt.s32.totalorder %s202_s21, %s202_s21 }
   0xc   :  { %p209_p6 = por %p208_p5, %p207_p4 }
   0xe   :  { %p210_p7 = pnand %p209_p6, %p203_p3 }
  0x10   :  { %213 = shalt.err (!%p210_p7)
}
  0x11   :  { %s265_s22 = smov 128   ;;  %s266_s23 = smov 8  }
  0x12   :  { %22 = dma.hbm_to_vmem [thread:$0]  %s337_s0, 256, %s17_s13, [#allocation3], %s265_s22, %s265_s22, %s266_s23  }
  0x13   :  { %s267_s26 = smov [#allocation5]   ;;  %s214_s30 = scalar_lea.hbm %s338_s1, 512 }
  0x14   :  { %s28_s27 = sshll.u32 %s267_s26, 4  ;;  %p215_p8 = scmp.ne.s32.totalorder %s338_s1, %s214_s30  ;;  %s29_s27 = int_to_ptr.vmem [resolvable:$true] %s28_s27 }
  0x15   :  { %p218_p9 = scmp.lt.u32.totalorder %s214_s30, %s338_s1 }
  0x17   :  { %p220_p10 = pnand %p218_p9, %p215_p8 }
  0x19   :  { %223 = shalt.err (!%p220_p10)
}
  0x1a   :  { %s224_s8 = scalar_lea.vmem %s29_s27, 512  ;;  %p229_p12 = scmp.lt.s32.totalorder %s29_s27, %s29_s27 }
  0x1b   :  { %p225_p11 = scmp.ne.s32.totalorder %s29_s27, %s224_s8  ;;  %p230_p13 = scmp.lt.s32.totalorder %s224_s8, %s224_s8 }
  0x1d   :  { %p231_p0 = por %p230_p13, %p229_p12 }
  0x1f   :  { %p232_p1 = pnand %p231_p0, %p225_p11 }
  0x21   :  { %235 = shalt.err (!%p232_p1)
}
  0x22   :  { %34 = dma.hbm_to_vmem [thread:$0]  %s338_s1, 512, %s29_s27, [#allocation6], %s265_s22, %s265_s22, %s266_s23  }
  0x23   :  { %258 = dma.done.wait [#allocation3], 256  }
  0x24   :  { %259 = vsyncadd [#allocation3], 4294967040 }
  0x25   :  { %260 = dma.done.wait [#allocation6], 512  }
  0x26   :  { %261 = vsyncadd [#allocation6], 4294966784  ;;  %vm56_vm0 = vcmask 261120   ;;  %v45_v0 = vld [vmem:[#allocation5] sm:$0xff]  ;;  %v46_v1 = vld [vmem:[#allocation5 + $0x8] sm:$0xff]  ;;  %s268_s11 = smov [#allocation7]  }
  0x27   :  { %v47_v2 = vld [vmem:[#allocation5 + $0x10] sm:$0xff]  ;;  %v179_v3 = vpack.c.bf16 %v46_v1, %v45_v0  ;;  %v48_v4 = vld [vmem:[#allocation5 + $0x18] sm:$0xff]  ;;  %s146_s12 = sshll.u32 %s268_s11, 4  ;;  %vm138_vm1 = vcmask 523264   ;;  %s147_s12 = int_to_ptr.vmem [resolvable:$true] %s146_s12 }
  0x28   :  { %v43_v5 = vld [vmem:[#allocation2] sm:$0xff]  ;;  %v183_v6 = vpack.c.bf16 %v48_v4, %v47_v2  ;;  %v44_v7 = vld [vmem:[#allocation2 + $0x8] sm:$0xff]  ;;  %s236_s13 = scalar_lea.vmem %s147_s12, 256  ;;  %p241_p3 = scmp.lt.s32.totalorder %s147_s12, %s147_s12 }
  0x29   :  { %176 = vmatprep.mubr.msk.f32.mxu0 %vm56_vm0, %v43_v5  ;;  %180 = vmatprep.subr.bf16.mxu0 %v179_v3  ;;  %v159_v8 = vld [vmem:[%s339_s2] ss:$0 sm:$0xff]  ;;  %p237_p2 = scmp.ne.s32.totalorder %s147_s12, %s236_s13  ;;  %p242_p4 = scmp.lt.s32.totalorder %s236_s13, %s236_s13 }
  0x2a   :  { %182 = vmatpush3.bf16.msra.mxu0 %v179_v3 }
  0x2b   :  { %184 = vmatprep.subr.bf16.mxu0 %v183_v6  ;;  %p243_p5 = por %p242_p4, %p241_p3 }
  0x2d   :  { %p244_p6 = pnand %p243_p5, %p237_p2 }
  0x2e   :  { %186 = vmatpush3.bf16.msra.mxu0 %v183_v6 }
  0x31   :  { %177 = vmatmul.mubr.msk.f32.vlgmr.msra.gmra.mrb[0].mxu0 %vm56_vm0, %v44_v7 }
 0x104   :  { %v178_v9 = vpop.f32.mrb[0].mxu0 }
 0x105   :  { %v135_v10 = vadd.f32 %v178_v9, %v159_v8  ;;  %v129_v11 = vpop.f32.mrb[1].mxu0 }
 0x106   :  { %v130_v12 = vadd.f32 %v159_v8, %v129_v11 }
 0x107   :  { %140 = vst.msk [vmem:[#allocation7 + $0x8] sm:$0xff] %vm138_vm1, %v135_v10 }
 0x108   :  { %139 = vst.msk [vmem:[#allocation7] sm:$0xff] %vm138_vm1, %v130_v12 }
 0x109   :  { %247 = shalt.err (!%p244_p6)
}
 0x10a   :  { %s248_s2 = scalar_lea.hbm %s340_s3, 256 }
 0x10b   :  { %p249_p7 = scmp.ne.s32.totalorder %s340_s3, %s248_s2  ;;  %p252_p8 = scmp.lt.u32.totalorder %s248_s2, %s340_s3 }
 0x10d   :  { %p254_p9 = pnand %p252_p8, %p249_p7 }
 0x10f   :  { %257 = shalt.err (!%p254_p9)
}
 0x110   :  { %152 = dma.vmem_to_hbm [thread:$0]  %s147_s12, 256, %s340_s3, [#allocation4], %s265_s22, %s265_s22, %s266_s23  }
 0x111   :  { %262 = dma.done.wait [#allocation4], 256  }
 0x112   :  { %263 = vsyncadd [#allocation4], 4294967040 }
 0x113   :  { %156 = vsyncpa [#allocation3], 1 }
 0x114   :  { %157 = vsyncpa [#allocation6], 1 }
 0x115   :  { %158 = vsyncpa [#allocation4], 1 }

</bundles_post_ra>
